<compile_context>
chip_gen: v6e
topology: v6e:2x2x1
jax: 0.10.0
libtpu: 0.0.40
codegen_flags: <defaults>
</compile_context>

<pallas_src>
import jax
import jax.numpy as jnp
import numpy as np
from jax.experimental import pallas as pl
from jax.experimental.pallas import tpu as pltpu


def _round_up(x, m):
    return -(-x // m) * m


def _fused_mlp_kernel(x_ref, w1_ref, w2_ref, w3_ref, o_ref):
    """Block-diagonal fused 3-layer MLP for all agents.

    Shapes (TB = batch tile):
      x : (TB, D0) f32   concatenated per-agent obs + constant-1 lane
      w1: (D0, D1) bf16  block-diagonal, b1 folded into the constant row
      w2: (D1, D2) bf16  block-diagonal, b2 folded, constant lane propagated
      w3: (D2, D3) bf16  block-diagonal, b3 folded
      o : (TB, D3) f32   per-agent Q-heads at lane offsets a*OUT_BLOCK
    One plain 2-D MXU matmul per layer, f32 accumulation.
    """
    x = x_ref[...].astype(jnp.bfloat16)
    h = jnp.dot(x, w1_ref[...], preferred_element_type=jnp.float32)
    h = jnp.maximum(h, 0.0).astype(jnp.bfloat16)
    h = jnp.dot(h, w2_ref[...], preferred_element_type=jnp.float32)
    h = jnp.maximum(h, 0.0).astype(jnp.bfloat16)
    o = jnp.dot(h, w3_ref[...], preferred_element_type=jnp.float32)
    o_ref[...] = o.astype(o_ref.dtype)


def fused_forward(x, w1, w2, w3, *, batch_tile=2048):
    """Single pallas_call over the whole multi-agent forward.

    Total operand footprint is a few hundred KB at most -> everything is
    whole-array VMEM resident; the only grid axis is the batch (parallel),
    which is a single step for inference-sized batches.
    """
    b, d0 = x.shape
    d3 = w3.shape[1]
    tb = min(b, batch_tile)
    num_tiles = pl.cdiv(b, tb)
    b_pad = num_tiles * tb
    if b_pad != b:
        x = jnp.pad(x, ((0, b_pad - b), (0, 0)))
    out = pl.pallas_call(
        _fused_mlp_kernel,
        out_shape=jax.ShapeDtypeStruct((b_pad, d3), jnp.float32),
        grid=(num_tiles,),
        in_specs=[
            pl.BlockSpec((tb, d0), lambda i: (i, 0)),
            pl.BlockSpec(w1.shape, lambda i: (0, 0)),
            pl.BlockSpec(w2.shape, lambda i: (0, 0)),
            pl.BlockSpec(w3.shape, lambda i: (0, 0)),
        ],
        out_specs=pl.BlockSpec((tb, d3), lambda i: (i, 0)),
        compiler_params=pltpu.CompilerParams(dimension_semantics=("parallel",)),
    )(x, w1, w2, w3)
    return out[:b] if b_pad != b else out


def init_agent_params(key, dims):
    """Deterministic init for one agent's MLP. dims = [in, h1, h2, out].

    Weights stored as (in, out) (transpose of torch Linear's (out, in)).
    # TODO(synk): torch orthogonal init has no exact parity here; scaled normal used.
    """
    assert len(dims) == 4, "this kernel fuses exactly 3 linear layers (2 hidden)"
    params = {}
    for li, (din, dout) in enumerate(zip(dims[:-1], dims[1:]), start=1):
        key, wk, bk = jax.random.split(key, 3)
        scale = 1.0 / jnp.sqrt(jnp.float32(din))
        params[f"w{li}"] = jax.random.normal(wk, (din, dout), jnp.float32) * scale
        params[f"b{li}"] = jax.random.normal(bk, (dout,), jnp.float32) * 0.1
    return params


class MultiAgentIndependentNetworkPallas:
    """JAX/Pallas counterpart of the PyTorch MultiAgentIndependentNetwork."""

    def __init__(self, input_sizes, hidden_dims, output_sizes, key):
        assert len(input_sizes) == len(output_sizes), \
            "Expect same number of input and output sizes"
        assert len(hidden_dims) == 2, "kernel fuses exactly 3 linear layers"
        # use_rnn=False branch only.
        # TODO(synk): torch.jit.fork per-agent parallelism has no Pallas analogue;
        #             all agents are fused into one block-diagonal pallas_call.
        self.input_sizes = list(input_sizes)
        self.output_sizes = list(output_sizes)
        self.num_agents = num_agents = len(input_sizes)
        h1, h2 = hidden_dims

        # Per-agent (un-packed) params, kept for the reference check.
        self.params = []
        for in_size, out_size in zip(input_sizes, output_sizes):
            key, sub = jax.random.split(key)
            self.params.append(init_agent_params(sub, [in_size, h1, h2, out_size]))

        # ---- Block-diagonal packing (one-time, host side, numpy) -----------
        in_pad = _round_up(max(self.input_sizes), 8)     # per-agent obs slot
        out_block = _round_up(max(self.output_sizes), 8)  # per-agent Q-head slot
        while (num_agents * out_block) % 128 != 0:        # lane-dense output slab
            out_block += 8
        d0 = num_agents * in_pad + 8   # + constant-1 lane (sublane-padded)
        d1 = num_agents * h1 + 8
        d2 = num_agents * h2 + 8
        d3 = num_agents * out_block
        c0, c1, c2 = num_agents * in_pad, num_agents * h1, num_agents * h2

        w1 = np.zeros((d0, d1), np.float32)
        w2 = np.zeros((d1, d2), np.float32)
        w3 = np.zeros((d2, d3), np.float32)
        for a, p in enumerate(self.params):
            n_in, n_out = self.input_sizes[a], self.output_sizes[a]
            # Agent a's rows are aligned with its slice of the concatenated input
            # (zero rows cover the zero-padded obs lanes of narrower observations).
            w1[a*in_pad:a*in_pad + n_in, a*h1:(a+1)*h1] = np.asarray(p["w1"])
            w1[c0, a*h1:(a+1)*h1] = np.asarray(p["b1"])
            w2[a*h1:(a+1)*h1, a*h2:(a+1)*h2] = np.asarray(p["w2"])
            w2[c1, a*h2:(a+1)*h2] = np.asarray(p["b2"])
            w3[a*h2:(a+1)*h2, a*out_block:a*out_block + n_out] = np.asarray(p["w3"])
            w3[c2, a*out_block:a*out_block + n_out] = np.asarray(p["b3"])
        # Propagate the constant-1 lane through the hidden layers (exact in bf16).
        w1[c0, c1] = 1.0
        w2[c1, c2] = 1.0

        # MXU-native dtype; f32 accumulation happens inside the kernel.
        self.w1 = jnp.asarray(w1, jnp.bfloat16)
        self.w2 = jnp.asarray(w2, jnp.bfloat16)
        self.w3 = jnp.asarray(w3, jnp.bfloat16)

        self.in_pad, self.out_block = in_pad, out_block
        in_sizes = tuple(self.input_sizes)
        out_sizes = tuple(self.output_sizes)
        n_const = d0 - num_agents * in_pad   # 8 lanes: [1, 0, ..., 0]

        @jax.jit
        def _forward(inputs, w1_, w2_, w3_):
            batch = inputs[0].shape[0]
            cols = [jnp.pad(x.astype(jnp.float32), ((0, 0), (0, in_pad - s)))
                    for x, s in zip(inputs, in_sizes)]
            const = jnp.concatenate(
                [jnp.ones((batch, 1), jnp.float32),
                 jnp.zeros((batch, n_const - 1), jnp.float32)], axis=1)
            x_full = jnp.concatenate(cols + [const], axis=1)        # (B, d0)
            out = fused_forward(x_full, w1_, w2_, w3_)              # (B, d3)
            return [out[:, a*out_block:a*out_block + out_sizes[a]]
                    for a in range(len(out_sizes))]

        self._forward = _forward

    def __call__(self, inputs, hiddens=None):
        if hiddens is None:
            hiddens = [None] * len(inputs)
        outs = self._forward(tuple(inputs), self.w1, self.w2, self.w3)
        new_hiddens = [None for _ in inputs]   # use_rnn=False -> no hidden state
        return outs, new_hiddens

    def init_hiddens(self, batch_size):
        return [None for _ in self.params]


def _reference_forward(inputs, params_list):
    """Plain-JAX f32 reference (per-agent, un-packed) for correctness checking."""
    outs = []
    for x, p in zip(inputs, params_list):
        h = jnp.maximum(x @ p["w1"] + p["b1"], 0.0)
        h = jnp.maximum(h @ p["w2"] + p["b2"], 0.0)
        outs.append(h @ p["w3"] + p["b3"])
    return outs


if __name__ == "__main__":
    key = jax.random.PRNGKey(0)

    # simple_tag-like setup: 3 adversaries (obs dim 16) + 1 good agent (obs dim 14),
    # 5 discrete actions each, hidden_dims=[32, 32].
    input_sizes = [16, 16, 16, 14]
    output_sizes = [5, 5, 5, 5]
    hidden_dims = [32, 32]

    key, net_key = jax.random.split(key)
    net = MultiAgentIndependentNetworkPallas(input_sizes, hidden_dims,
                                             output_sizes, net_key)

    def make_inputs(k, batch):
        ins = []
        for s in input_sizes:
            k, xk = jax.random.split(k)
            ins.append(jax.random.normal(xk, (batch, s), jnp.float32))
        return k, ins

    # 1) Inference-sized batch (single grid step).
    key, inputs = make_inputs(key, 2)
    outs, hiddens = net(inputs, hiddens=None)
    outs = [jax.block_until_ready(o) for o in outs]
    refs = _reference_forward(inputs, net.params)
    for o, r, out_size in zip(outs, refs, output_sizes):
        assert o.shape == (2, out_size), o.shape
        # bf16 weights/activations vs f32 reference -> loosened tolerance.
        assert jnp.allclose(o, r, atol=5e-2, rtol=5e-2), "mismatch vs reference (B=2)"
    assert all(h is None for h in hiddens)
    assert net.init_hiddens(2) == [None] * len(input_sizes)

    # 2) Training-sized batch exercising the parallel batch grid (2 x 2048 tiles).
    key, big_inputs = make_inputs(key, 4096)
    big_outs, _ = net(big_inputs, hiddens=None)
    big_outs = [jax.block_until_ready(o) for o in big_outs]
    big_refs = _reference_forward(big_inputs, net.params)
    for o, r in zip(big_outs, big_refs):
        assert jnp.allclose(o, r, atol=1e-1, rtol=1e-1), "mismatch vs reference (B=4096)"

    print("KERNEL_OK")
</pallas_src>

<mosaic_0001>
module attributes {stable_mosaic.version = 11 : i64} {
  func.func @_fused_mlp_kernel(%arg0: i32, %arg1: memref<2x72xf32, #tpu.memory_space<vmem>>, %arg2: memref<72x136xbf16, #tpu.memory_space<vmem>>, %arg3: memref<136x136xbf16, #tpu.memory_space<vmem>>, %arg4: memref<136x128xbf16, #tpu.memory_space<vmem>>, %arg5: memref<2x128xf32, #tpu.memory_space<vmem>>) attributes {dimension_semantics = [#tpu.dimension_semantics<parallel>], iteration_bounds = array<i64: 1>, scalar_prefetch = 0 : i64, scratch_operands = 0 : i64, tpu.core_type = #tpu.core_type<tc>, window_params = [{transform_indices = @transform_0, window_bounds = array<i64: 2, 72>}, {pipeline_mode = #tpu.pipeline_mode<synchronous>, transform_indices = @transform_1, window_bounds = array<i64: 72, 136>}, {pipeline_mode = #tpu.pipeline_mode<synchronous>, transform_indices = @transform_2, window_bounds = array<i64: 136, 136>}, {pipeline_mode = #tpu.pipeline_mode<synchronous>, transform_indices = @transform_3, window_bounds = array<i64: 136, 128>}, {transform_indices = @transform_4, window_bounds = array<i64: 2, 128>}]} {
    %c0 = arith.constant 0 : index
    %c0_0 = arith.constant 0 : index
    %0 = vector.load %arg1[%c0, %c0_0] : memref<2x72xf32, #tpu.memory_space<vmem>>, vector<2x72xf32>
    %1 = arith.truncf %0 : vector<2x72xf32> to vector<2x72xbf16>
    %c0_1 = arith.constant 0 : index
    %c0_2 = arith.constant 0 : index
    %2 = vector.load %arg2[%c0_1, %c0_2] : memref<72x136xbf16, #tpu.memory_space<vmem>>, vector<72x136xbf16>
    %cst = arith.constant dense<0.000000e+00> : vector<2x136xf32>
    %3 = tpu.matmul %1, %2, %cst {dimension_numbers = #tpu.dot_dimension_numbers<[1], [0], [0], [1], [0, 0, 1, 1], [], []>} : vector<2x72xbf16>, vector<72x136xbf16>, vector<2x136xf32> -> vector<2x136xf32>
    %cst_3 = arith.constant 0.000000e+00 : f32
    %4 = vector.broadcast %cst_3 : f32 to vector<2x136xf32>
    %5 = arith.maximumf %3, %4 : vector<2x136xf32>
    %6 = arith.truncf %5 : vector<2x136xf32> to vector<2x136xbf16>
    %c0_4 = arith.constant 0 : index
    %c0_5 = arith.constant 0 : index
    %7 = vector.load %arg3[%c0_4, %c0_5] : memref<136x136xbf16, #tpu.memory_space<vmem>>, vector<136x136xbf16>
    %cst_6 = arith.constant dense<0.000000e+00> : vector<2x136xf32>
    %8 = tpu.matmul %6, %7, %cst_6 {dimension_numbers = #tpu.dot_dimension_numbers<[1], [0], [0], [1], [0, 0, 1, 1], [], []>} : vector<2x136xbf16>, vector<136x136xbf16>, vector<2x136xf32> -> vector<2x136xf32>
    %cst_7 = arith.constant 0.000000e+00 : f32
    %9 = vector.broadcast %cst_7 : f32 to vector<2x136xf32>
    %10 = arith.maximumf %8, %9 : vector<2x136xf32>
    %11 = arith.truncf %10 : vector<2x136xf32> to vector<2x136xbf16>
    %c0_8 = arith.constant 0 : index
    %c0_9 = arith.constant 0 : index
    %12 = vector.load %arg4[%c0_8, %c0_9] : memref<136x128xbf16, #tpu.memory_space<vmem>>, vector<136x128xbf16>
    %cst_10 = arith.constant dense<0.000000e+00> : vector<2x128xf32>
    %13 = tpu.matmul %11, %12, %cst_10 {dimension_numbers = #tpu.dot_dimension_numbers<[1], [0], [0], [1], [0, 0, 1, 1], [], []>} : vector<2x136xbf16>, vector<136x128xbf16>, vector<2x128xf32> -> vector<2x128xf32>
    %c0_11 = arith.constant 0 : index
    %c0_12 = arith.constant 0 : index
    %14 = vector.load %arg5[%c0_11, %c0_12] : memref<2x128xf32, #tpu.memory_space<vmem>>, vector<2x128xf32>
    tpu.vector_store %arg5[%c0_11, %c0_12], %13 {strides = array<i32>} : memref<2x128xf32, #tpu.memory_space<vmem>>, vector<2x128xf32>,
    return
  }
  func.func @transform_0(%arg0: i32) -> (i32, i32) {
    %c0_i32 = arith.constant 0 : i32
    %c0_i32_0 = arith.constant 0 : i32
    return %arg0, %c0_i32 : i32, i32
  }
  func.func @transform_1(%arg0: i32) -> (i32, i32) {
    %c0_i32 = arith.constant 0 : i32
    %c0_i32_0 = arith.constant 0 : i32
    %c0_i32_1 = arith.constant 0 : i32
    return %c0_i32, %c0_i32_0 : i32, i32
  }
  func.func @transform_2(%arg0: i32) -> (i32, i32) {
    %c0_i32 = arith.constant 0 : i32
    %c0_i32_0 = arith.constant 0 : i32
    %c0_i32_1 = arith.constant 0 : i32
    return %c0_i32, %c0_i32_0 : i32, i32
  }
  func.func @transform_3(%arg0: i32) -> (i32, i32) {
    %c0_i32 = arith.constant 0 : i32
    %c0_i32_0 = arith.constant 0 : i32
    %c0_i32_1 = arith.constant 0 : i32
    return %c0_i32, %c0_i32_0 : i32, i32
  }
  func.func @transform_4(%arg0: i32) -> (i32, i32) {
    %c0_i32 = arith.constant 0 : i32
    %c0_i32_0 = arith.constant 0 : i32
    return %arg0, %c0_i32 : i32, i32
  }
}

</mosaic_0001>

<bundles_post_ra>
// kernel: _forward.1
= control target key start
LH: loop header
LB: loop body
LE: loop exit
PB: predicated region body
PF: predicated region fallthrough
CT: control target
= control target key end

     0   :  { %9 = vsyncpa [#allocation3], 0  ;;  %s538_s15 = smov [#allocation2]   ;;  %s671_s0 = inlined_call_operand.vmem [shape: f32[2,72], index: 0, kind: input, shape index: {}]   ;;  %s672_s1 = inlined_call_operand.vmem [shape: bf16[72,136], index: 1, kind: input, shape index: {}]   ;;  %s673_s2 = inlined_call_operand.vmem [shape: bf16[136,136], index: 2, kind: input, shape index: {}]   ;;  %s674_s3 = inlined_call_operand.hbm [shape: bf16[136,128], index: 3, kind: input, shape index: {}]   ;;  %s675_s4 = inlined_call_operand.vmem [shape: f32[2,128], index: 4, kind: output, shape index: {}]  }
   0x1   :  { %s21_s16 = sshll.u32 %s538_s15, 4  ;;  %s22_s16 = int_to_ptr.vmem [resolvable:$true] %s21_s16 }
   0x2   :  { %s524_s17 = scalar_lea.vmem %s22_s16, 1088  ;;  %p529_p1 = scmp.lt.s32.totalorder %s22_s16, %s22_s16 }
   0x3   :  { %p525_p0 = scmp.ne.s32.totalorder %s22_s16, %s524_s17  ;;  %p530_p2 = scmp.lt.s32.totalorder %s524_s17, %s524_s17 }
   0x5   :  { %p531_p3 = por %p530_p2, %p529_p1 }
   0x7   :  { %p532_p4 = pnand %p531_p3, %p525_p0 }
   0x9   :  { %535 = shalt.err (!%p532_p4)
}
   0xa   :  { %s539_s18 = smov 64   ;;  %s540_s19 = smov 4  }
   0xb   :  { %27 = dma.hbm_to_vmem [thread:$0]  %s674_s3, 1088, %s22_s16, [#allocation3], %s539_s18, %s539_s18, %s540_s19  }
   0xc   :  { %536 = dma.done.wait [#allocation3], 1088  }
   0xd   :  { %537 = vsyncadd [#allocation3], 4294966208  ;;  %v541_v0 = vmov 0   ;;  %v42_v1 = vld [vmem:[%s672_s1 + $0x40] sm:$0xff]  ;;  %vm92_vm0 = vcmask 1043456   ;;  %vm88_vm1 = vcmask 588800  }
   0xe   :  { %131 = vmatprep.mubr.bf16.mxu0 %v541_v0  ;;  %v430_v2 = vcombine.high %v42_v1, %v42_v1  ;;  %v429_v3 = vcombine.low %v42_v1, %v42_v1  ;;  %v469_v4 = vld [vmem:[%s672_s1 + $0x34] ss:$8 sps:$4 sm:$0xff]   ;;  %v471_v6 = vld [vmem:[%s672_s1 + $0x30] ss:$8 sps:$4 sm:$0xff]   ;;  %v472_v7 = vld [vmem:[%s672_s1 + $0x24] ss:$8 sps:$4 sm:$0xff]  }
   0xf   :  { %v481_v8 = vld [vmem:[%s673_s2 + $0x74] ss:$8 sps:$4 sm:$0xff]   ;;  %v483_v9 = vld [vmem:[%s673_s2 + $0x70] ss:$8 sps:$4 sm:$0xff]   ;;  %v474_v10 = vld [vmem:[%s672_s1 + $0x20] ss:$8 sps:$4 sm:$0xff]  }
  0x10   :  { %431 = vmatprep.subr.msk.bf16.mxu0 %vm92_vm0, %v430_v2  ;;  %v94_v5 = vsel %vm92_vm0, %v429_v3, 0  ;;  %256 = vmatprep.subr.bf16.mxu1 %v481_v8  ;;  %v484_v11 = vld [vmem:[%s673_s2 + $0x64] ss:$8 sps:$4 sm:$0xff]   ;;  %v475_v12 = vld [vmem:[%s672_s1 + $0x14] ss:$8 sps:$4 sm:$0xff]   ;;  %vm246_vm2 = vcmask 64512  }
  0x11   :  { %106 = vmatpush1.bf16.msra.mxu0 %v94_v5  ;;  %257 = vmatpush1.bf16.msra.mxu1 %v483_v9  ;;  %v486_v13 = vld [vmem:[%s673_s2 + $0x60] ss:$8 sps:$4 sm:$0xff]   ;;  %v487_v14 = vld [vmem:[%s673_s2 + $0x54] ss:$8 sps:$4 sm:$0xff]   ;;  %v477_v15 = vld [vmem:[%s672_s1 + $0x10] ss:$8 sps:$4 sm:$0xff]  }
  0x12   :  { %107 = vmatprep.subr.bf16.mxu0 %v469_v4  ;;  %258 = vmatprep.subr.bf16.mxu1 %v484_v11  ;;  %v478_v16 = vld [vmem:[%s672_s1 + $0x4] ss:$8 sps:$4 sm:$0xff]   ;;  %v489_v17 = vld [vmem:[%s673_s2 + $0x50] ss:$8 sps:$4 sm:$0xff]   ;;  %v480_v18 = vld [vmem:[%s672_s1] ss:$8 sps:$4 sm:$0xff]  }
  0x13   :  { %v32_v19 = vld [vmem:[%s671_s0] sm:$0x3]  ;;  %v490_v20 = vld [vmem:[%s673_s2 + $0x44] ss:$8 sps:$4 sm:$0xff]   ;;  %v493_v22 = vld [vmem:[%s673_s2 + $0x34] ss:$8 sps:$4 sm:$0xff]  }
  0x14   :  { %v492_v21 = vld [vmem:[%s673_s2 + $0x40] ss:$8 sps:$4 sm:$0xff]   ;;  %v33_v23 = vpack.c.bf16 %v32_v19, %v32_v19  ;;  %v495_v24 = vld [vmem:[%s673_s2 + $0x30] ss:$8 sps:$4 sm:$0xff]   ;;  %v496_v25 = vld [vmem:[%s673_s2 + $0x24] ss:$8 sps:$4 sm:$0xff]  }
  0x15   :  { %108 = vmatpush1.bf16.msra.mxu0 %v471_v6  ;;  %259 = vmatpush1.bf16.msra.mxu1 %v486_v13  ;;  %v498_v26 = vld [vmem:[%s673_s2 + $0x20] ss:$8 sps:$4 sm:$0xff]   ;;  %v499_v27 = vld [vmem:[%s673_s2 + $0x14] ss:$8 sps:$4 sm:$0xff]   ;;  %v501_v28 = vld [vmem:[%s673_s2 + $0x10] ss:$8 sps:$4 sm:$0xff]  }
  0x16   :  { %109 = vmatprep.subr.bf16.mxu0 %v472_v7  ;;  %260 = vmatprep.subr.bf16.mxu1 %v487_v14  ;;  %v502_v29 = vld [vmem:[%s673_s2 + $0x4] ss:$8 sps:$4 sm:$0xff]   ;;  %v504_v30 = vld [vmem:[%s673_s2] ss:$8 sps:$4 sm:$0xff]   ;;  %v507_v35 = vld [vmem:[#allocation2 + $0x38] sm:$0xff]  }
  0x17   :  { %v160_v31 = vld [vmem:[%s673_s2 + $0x80] sm:$0xff]  ;;  %v508_v36 = vld [vmem:[#allocation2 + $0x30] sm:$0xff]   ;;  %v509_v37 = vld [vmem:[#allocation2 + $0x28] sm:$0xff]  }
  0x18   :  { %v450_v32 = vcombine.high %v160_v31, %v160_v31  ;;  %v449_v33 = vcombine.low %v160_v31, %v160_v31  ;;  %v510_v38 = vld [vmem:[#allocation2 + $0x20] sm:$0xff]   ;;  %v511_v39 = vld [vmem:[#allocation2 + $0x18] sm:$0xff]   ;;  %v512_v40 = vld [vmem:[#allocation2 + $0x10] sm:$0xff]  }
  0x19   :  { %110 = vmatpush1.bf16.msra.mxu0 %v474_v10  ;;  %261 = vmatpush1.bf16.msra.mxu1 %v489_v17  ;;  %v513_v41 = vld [vmem:[#allocation2 + $0x8] sm:$0xff]   ;;  %v514_v50 = vld [vmem:[#allocation2] sm:$0xff]  }
  0x1a   :  { %111 = vmatprep.subr.bf16.mxu0 %v475_v12  ;;  %262 = vmatprep.subr.bf16.mxu1 %v490_v20  ;;  %v251_v34 = vsel %vm92_vm0, %v449_v33, 0  ;;  %v515_v51 = vld [vmem:[#allocation2 + $0x40] ss:$0 sps:$4 sm:$0xff]  }
  0x1b   :  { %v373_v52 = vsel %vm92_vm0, %v515_v51, 0 }
  0x1d   :  { %112 = vmatpush1.bf16.msra.mxu0 %v477_v15  ;;  %263 = vmatpush1.bf16.msra.mxu1 %v492_v21 }
  0x1e   :  { %113 = vmatprep.subr.bf16.mxu0 %v478_v16  ;;  %264 = vmatprep.subr.bf16.mxu1 %v493_v22 }
  0x21   :  { %114 = vmatpush1.bf16.msra.mxu0 %v480_v18  ;;  %265 = vmatpush1.bf16.msra.mxu1 %v495_v24 }
  0x22   :  { %375 = vmatprep.subr.bf16.mxu0 %v541_v0  ;;  %266 = vmatprep.subr.bf16.mxu1 %v496_v25 }
  0x24   :  { %432 = vmatmul.mubr.msk.bf16.vlgmr.msra.gmra.mxu0 %vm88_vm1, %v33_v23 }
  0x25   :  { %267 = vmatpush1.bf16.msra.mxu1 %v498_v26  ;;  %376 = vmatpush1.bf16.msra.mxu0 %v507_v35 }
  0x26   :  { %268 = vmatprep.subr.bf16.mxu1 %v499_v27  ;;  %377 = vmatprep.subr.bf16.mxu0 %v541_v0 }
  0x29   :  { %269 = vmatpush1.bf16.msra.mxu1 %v501_v28  ;;  %378 = vmatpush1.bf16.msra.mxu0 %v508_v36 }
  0x2a   :  { %270 = vmatprep.subr.bf16.mxu1 %v502_v29  ;;  %379 = vmatprep.subr.bf16.mxu0 %v541_v0 }
  0x2d   :  { %271 = vmatpush1.bf16.msra.mxu1 %v504_v30  ;;  %380 = vmatpush1.bf16.msra.mxu0 %v509_v37 }
  0x2e   :  { %451 = vmatprep.subr.msk.bf16.mxu1 %vm92_vm0, %v450_v32  ;;  %381 = vmatprep.subr.bf16.mxu0 %v541_v0 }
  0x31   :  { %287 = vmatpush2.bf16.msra.mxu1 %v251_v34  ;;  %382 = vmatpush1.bf16.msra.mxu0 %v510_v38 }
  0x32   :  { %383 = vmatprep.subr.bf16.mxu0 %v541_v0 }
  0x35   :  { %384 = vmatpush1.bf16.msra.mxu0 %v511_v39 }
  0x36   :  { %385 = vmatprep.subr.bf16.mxu0 %v541_v0 }
  0x39   :  { %386 = vmatpush1.bf16.msra.mxu0 %v512_v40 }
  0x3a   :  { %387 = vmatprep.subr.bf16.mxu0 %v541_v0 }
  0x3d   :  { %388 = vmatpush1.bf16.msra.mxu0 %v513_v41 }
  0x3e   :  { %389 = vmatprep.subr.bf16.mxu0 %v541_v0 }
  0x41   :  { %390 = vmatpush1.bf16.msra.mxu0 %v514_v50 }
  0x42   :  { %405 = vmatprep.subr.bf16.mxu0 %v541_v0 }
  0x45   :  { %406 = vmatpush2.bf16.msra.mxu0 %v373_v52 }
  0xe4   :  { %v133_v42 = vpop.f32.mrf.mxu0 }
  0xe5   :  { %v140_v43 = vmax.f32 %v133_v42, 0.0 }
  0xe6   :  { %v135_v44 = vpop.f32.mrf.mxu0 }
  0xe7   :  { %v141_v45 = vmax.f32 %v135_v44, 0.0  ;;  %v142_v48 = vpack.c.bf16 %v140_v43, %v140_v43 }
  0xe8   :  { %v137_v46 = vpop.f32.mrf.mxu0 }
  0xe9   :  { %v143_v47 = vpack.c.bf16 %v141_v45, %v141_v45 }
  0xea   :  { %v138_v49 = vpop.f32.mrf.mxu0 }
  0xeb   :  { %452 = vmatprep.mubr.msk.bf16.mxu1 %vm246_vm2, %v143_v47 }
  0xec   :  { %289 = vmatmul.mubr.bf16.vlgmr.msra.gmra.mxu1 %v142_v48 }
 0x1ac   :  { %v290_v53 = vpop.f32.mrf.mxu1 }
 0x1ad   :  { %v297_v54 = vmax.f32 %v290_v53, 0.0 }
 0x1ae   :  { %v292_v55 = vpop.f32.mrf.mxu1 }
 0x1af   :  { %v298_v56 = vmax.f32 %v292_v55, 0.0  ;;  %v299_v59 = vpack.c.bf16 %v297_v54, %v297_v54 }
 0x1b0   :  { %v294_v57 = vpop.f32.mrf.mxu1 }
 0x1b1   :  { %v300_v58 = vpack.c.bf16 %v298_v56, %v298_v56 }
 0x1b2   :  { %v295_v60 = vpop.f32.mrf.mxu1 }
 0x1b3   :  { %462 = vmatprep.mubr.msk.bf16.mxu0 %vm246_vm2, %v300_v58 }
 0x1b4   :  { %408 = vmatmul.mubr.bf16.vlgmr.msra.gmra.mxu0 %v299_v59 }
 0x274   :  { %v409_v61 = vpop.f32.mrf.mxu0 }
 0x275   :  { %415 = vst [vmem:[%s675_s4] sm:$0x3] %v409_v61 }
 0x276   :  { %v411_v62 = vpop.f32.mrf.mxu0 }
 0x278   :  { %v412_v63 = vpop.f32.mrf.mxu0 }
 0x27a   :  { %v413_v0 = vpop.f32.mrf.mxu0 }
 0x27b   :  { %420 = vsyncpa [#allocation3], 1 }

</bundles_post_ra>
